<compile_context>
chip_gen: v6e
topology: v6e:2x2x1
jax: 0.10.0
libtpu: 0.0.40
codegen_flags: <defaults>
</compile_context>

<pallas_src>
import math

import jax
import jax.numpy as jnp
import numpy as np
from jax.experimental import pallas as pl
from jax.experimental.pallas import tpu as pltpu

# ----------------------- model hyper-parameters (small) ----------------------
IN_DIM = 16       # state size
OUT_DIM = 4       # number of actions
ATOM_SIZE = 8     # distributional atoms
VMIN, VMAX = -10.0, 10.0
HID1, HID2 = 64, 32
BATCH = 2
HEAD = OUT_DIM * ATOM_SIZE   # 32 logits per column (action-major, atom-minor)
LANE = 128                   # TPU lane width; batch tiles are multiples of this


def _cdiv(a, b):
    return -(-a // b)


# --------------------------------- kernel ------------------------------------
def rainbow_kernel(xt_ref, w1_ref, b1_ref, w2_ref, b2_ref,
                   wht_ref, bht_ref, g_ref, vt_ref, qt_ref):
    xt = xt_ref[...]                                                     # (IN_DIM, TB)

    # feature_layer: Linear(in_dim,64) -> ReLU -> Dropout(0.1) -> Linear(64,32) -> ReLU
    # TODO(synk): nn.Dropout(0.1) is stochastic in train mode; treated as identity (eval mode).
    h = jnp.dot(w1_ref[...], xt, preferred_element_type=jnp.float32) + b1_ref[...]
    h = jnp.maximum(h, 0.0)                                              # (HID1, TB)
    f = jnp.dot(w2_ref[...], h, preferred_element_type=jnp.float32) + b2_ref[...]
    f = jnp.maximum(f, 0.0)                                              # (HID2, TB)

    # Fused NoisyLinear heads: one matmul yields
    #   logits[d*A + a, b] = q1[b, a] + q2[b, d, a] - mean_d' q2[b, d', a]
    # (q1 replication and the mean-over-actions are folded into wht/bht).
    logits = jnp.dot(wht_ref[...], f, preferred_element_type=jnp.float32) + bht_ref[...]  # (HEAD, TB)

    # Softmax over atoms within each action group — lane axis = batch, so the
    # per-sample max is a small sublane (XLU) reduce; it is constant within every
    # group, hence a valid stabilizer.
    m = jnp.max(logits, axis=0, keepdims=True)                           # (1, TB)
    e = jnp.exp(logits - m)                                              # (HEAD, TB)
    gs = jnp.dot(g_ref[...], e, preferred_element_type=jnp.float32)      # group sums, replicated per group
    gs = jnp.maximum(gs, 1e-30)                                          # NaN guard for fully-underflowed groups
    inv = pl.reciprocal(gs, approx=True)                                 # EUP slot, nearly free
    inv = inv * (2.0 - gs * inv)                                         # one Newton step -> ~f32-accurate
    p = jnp.maximum(e * inv, 0.001)                                      # dist.clamp(0.001)

    # q[d, b] = sum_a p[d*A + a, b] * values[a]  via a tiny constant matmul.
    qt_ref[...] = jnp.dot(vt_ref[...], p, preferred_element_type=jnp.float32)   # (OUT_DIM, TB)


# --------------------------------- wrapper -----------------------------------
def rainbow_forward(x, params, *, batch_tile=512):
    B = x.shape[0]

    # Balanced lane-granular batch tiling; >= 2 steps once B > 128 so v7x's second
    # TensorCore gets work (no measurable cost on single-TC v5e/v6e).
    n_steps = max(1, _cdiv(B, batch_tile))
    if B > LANE:
        n_steps = max(n_steps, 2)
    TB = _cdiv(_cdiv(B, n_steps), LANE) * LANE
    Bp = n_steps * TB

    xt = x.T                                                             # (IN_DIM, B)
    if Bp != B:
        xt = jnp.pad(xt, ((0, 0), (0, Bp - B)))

    weights = (params["w1"], params["b1"], params["w2"], params["b2"],
               params["wht"], params["bht"], params["G"], params["Vt"])

    def resident(a):
        # Full-array block, same block index every grid step -> stays in VMEM.
        nd = a.ndim
        return pl.BlockSpec(a.shape, lambda i, _nd=nd: (0,) * _nd)

    out_t = pl.pallas_call(
        rainbow_kernel,
        out_shape=jax.ShapeDtypeStruct((OUT_DIM, Bp), jnp.float32),
        grid=(n_steps,),
        in_specs=[pl.BlockSpec((IN_DIM, TB), lambda i: (0, i))]          # activations stream
                 + [resident(a) for a in weights],                       # weights resident
        out_specs=pl.BlockSpec((OUT_DIM, TB), lambda i: (0, i)),         # lane-dense output slab
        compiler_params=pltpu.CompilerParams(
            dimension_semantics=("parallel",)),                          # 2-TC sharding on v7x
    )(xt, *weights)
    return out_t[:, :B].T                                                # (B, OUT_DIM)


# ----------------------------- parameter setup --------------------------------
def _uniform(key, shape, lim):
    return jax.random.uniform(key, shape, jnp.float32, minval=-lim, maxval=lim)


def _scale_noise(key, size):
    x = jax.random.normal(key, (size,), jnp.float32)
    return jnp.sign(x) * jnp.sqrt(jnp.abs(x))


def noisy_linear_effective(key, in_f, out_f, std_init=0.6):
    """Effective (mu + sigma*eps) weight/bias of a NoisyLinear (factorized noise)."""
    # TODO(synk): NoisyLinear.reset_noise() semantics live outside the kernel; the caller
    # re-composes these effective weights whenever noise is refreshed.
    k1, k2, k3, k4 = jax.random.split(key, 4)
    mu_range = 1.0 / math.sqrt(in_f)
    w_mu = _uniform(k1, (out_f, in_f), mu_range)
    w_sigma = jnp.full((out_f, in_f), std_init / math.sqrt(in_f), jnp.float32)
    b_mu = _uniform(k2, (out_f,), mu_range)
    b_sigma = jnp.full((out_f,), std_init / math.sqrt(out_f), jnp.float32)
    eps_in = _scale_noise(k3, in_f)
    eps_out = _scale_noise(k4, out_f)
    W = w_mu + w_sigma * jnp.outer(eps_out, eps_in)
    b = b_mu + b_sigma * eps_out
    return W, b


def make_params(key):
    ks = jax.random.split(key, 6)
    lim1 = 1.0 / math.sqrt(IN_DIM)
    w1 = _uniform(ks[0], (HID1, IN_DIM), lim1)                           # torch (out, in)
    b1 = _uniform(ks[1], (HID1,), lim1)
    lim2 = 1.0 / math.sqrt(HID1)
    w2 = _uniform(ks[2], (HID2, HID1), lim2)
    b2 = _uniform(ks[3], (HID2,), lim2)
    wo1, bo1 = noisy_linear_effective(ks[4], HID2, ATOM_SIZE)            # (A, 32), (A,)
    wo2, bo2 = noisy_linear_effective(ks[5], HID2, ATOM_SIZE * OUT_DIM)  # (D*A, 32), (D*A,)
    values = jnp.linspace(VMIN, VMAX, ATOM_SIZE).astype(jnp.float32)

    # (final_layer NoisyLinear(64,32) exists in the torch module but is unused in forward.)

    # --- fused head precomposition: q1-replication, q2, and mean-over-actions are all
    #     linear in the feature vector, so fold them into ONE (HEAD, 32) weight/bias. ---
    wo1t, wo2t = wo1.T, wo2.T                                            # (32, A), (32, D*A)
    w2r = wo2t.reshape(HID2, OUT_DIM, ATOM_SIZE)
    b2r = bo2.reshape(OUT_DIM, ATOM_SIZE)
    wh = (wo1t[:, None, :] + w2r - w2r.mean(axis=1, keepdims=True)).reshape(HID2, HEAD)
    bh = (bo1[None, :] + b2r - b2r.mean(axis=0, keepdims=True)).reshape(HEAD)

    # Constant matrices: grouped-atom softmax sums and expectation over the support.
    idx = jnp.arange(HEAD)
    G = (idx[:, None] // ATOM_SIZE == idx[None, :] // ATOM_SIZE).astype(jnp.float32)    # (32, 32), symmetric
    Vt = jnp.kron(jnp.eye(OUT_DIM, dtype=jnp.float32), values.reshape(1, ATOM_SIZE))    # (4, 32)

    return {
        # kernel operands (batch-on-lanes / transposed layout)
        "w1": w1, "b1": b1.reshape(-1, 1),
        "w2": w2, "b2": b2.reshape(-1, 1),
        "wht": wh.T, "bht": bh.reshape(-1, 1),
        "G": G, "Vt": Vt,
        # raw (un-fused) parameters kept for the pure-JAX reference
        "wo1t": wo1t, "bo1": bo1.reshape(1, -1),
        "wo2t": wo2t, "bo2": bo2.reshape(1, -1),
        "values": values.reshape(1, -1),
    }


# ---------------------------- pure-JAX reference ------------------------------
def rainbow_reference(x, p):
    """Un-fused math exactly mirroring the torch module (validates fusion + transpose)."""
    h = jnp.maximum(x @ p["w1"].T + p["b1"].T, 0.0)
    f = jnp.maximum(h @ p["w2"].T + p["b2"].T, 0.0)
    q1 = (f @ p["wo1t"] + p["bo1"]).reshape(-1, 1, ATOM_SIZE)
    q2 = (f @ p["wo2t"] + p["bo2"]).reshape(-1, OUT_DIM, ATOM_SIZE)
    dist = q1 + q2 - q2.mean(1, keepdims=True)
    dist = jax.nn.softmax(dist, axis=-1)
    dist = jnp.maximum(dist, 0.001)
    return jnp.sum(dist * p["values"].reshape(1, 1, ATOM_SIZE), axis=2)


# ------------------------------------ main ------------------------------------
if __name__ == "__main__":
    key = jax.random.PRNGKey(0)
    kx, kp = jax.random.split(key)
    x = jax.random.normal(kx, (BATCH, IN_DIM), jnp.float32)
    params = make_params(kp)

    q = jax.block_until_ready(rainbow_forward(x, params))

    q_ref = rainbow_reference(x, params)
    np.testing.assert_allclose(np.asarray(q), np.asarray(q_ref), rtol=1e-4, atol=1e-4)

    print("KERNEL_OK")
</pallas_src>

<mosaic_0001>
module attributes {stable_mosaic.version = 11 : i64} {
  func.func @rainbow_kernel(%arg0: i32, %arg1: memref<16x128xf32, #tpu.memory_space<vmem>>, %arg2: memref<64x16xf32, #tpu.memory_space<vmem>>, %arg3: memref<64x1xf32, #tpu.memory_space<vmem>>, %arg4: memref<32x64xf32, #tpu.memory_space<vmem>>, %arg5: memref<32x1xf32, #tpu.memory_space<vmem>>, %arg6: memref<32x32xf32, #tpu.memory_space<vmem>>, %arg7: memref<32x1xf32, #tpu.memory_space<vmem>>, %arg8: memref<32x32xf32, #tpu.memory_space<vmem>>, %arg9: memref<4x32xf32, #tpu.memory_space<vmem>>, %arg10: memref<4x128xf32, #tpu.memory_space<vmem>>) attributes {dimension_semantics = [#tpu.dimension_semantics<parallel>], iteration_bounds = array<i64: 1>, scalar_prefetch = 0 : i64, scratch_operands = 0 : i64, tpu.core_type = #tpu.core_type<tc>, window_params = [{transform_indices = @transform_0, window_bounds = array<i64: 16, 128>}, {pipeline_mode = #tpu.pipeline_mode<synchronous>, transform_indices = @transform_1, window_bounds = array<i64: 64, 16>}, {pipeline_mode = #tpu.pipeline_mode<synchronous>, transform_indices = @transform_2, window_bounds = array<i64: 64, 1>}, {pipeline_mode = #tpu.pipeline_mode<synchronous>, transform_indices = @transform_3, window_bounds = array<i64: 32, 64>}, {pipeline_mode = #tpu.pipeline_mode<synchronous>, transform_indices = @transform_4, window_bounds = array<i64: 32, 1>}, {pipeline_mode = #tpu.pipeline_mode<synchronous>, transform_indices = @transform_5, window_bounds = array<i64: 32, 32>}, {pipeline_mode = #tpu.pipeline_mode<synchronous>, transform_indices = @transform_6, window_bounds = array<i64: 32, 1>}, {pipeline_mode = #tpu.pipeline_mode<synchronous>, transform_indices = @transform_7, window_bounds = array<i64: 32, 32>}, {pipeline_mode = #tpu.pipeline_mode<synchronous>, transform_indices = @transform_8, window_bounds = array<i64: 4, 32>}, {transform_indices = @transform_9, window_bounds = array<i64: 4, 128>}]} {
    %c0 = arith.constant 0 : index
    %c0_0 = arith.constant 0 : index
    %0 = vector.load %arg1[%c0, %c0_0] : memref<16x128xf32, #tpu.memory_space<vmem>>, vector<16x128xf32>
    %c0_1 = arith.constant 0 : index
    %c0_2 = arith.constant 0 : index
    %1 = vector.load %arg2[%c0_1, %c0_2] : memref<64x16xf32, #tpu.memory_space<vmem>>, vector<64x16xf32>
    %cst = arith.constant dense<0.000000e+00> : vector<64x128xf32>
    %2 = tpu.matmul %1, %0, %cst {dimension_numbers = #tpu.dot_dimension_numbers<[1], [0], [0], [1], [0, 0, 1, 1], [], []>} : vector<64x16xf32>, vector<16x128xf32>, vector<64x128xf32> -> vector<64x128xf32>
    %c0_3 = arith.constant 0 : index
    %c0_4 = arith.constant 0 : index
    %3 = vector.load %arg3[%c0_3, %c0_4] : memref<64x1xf32, #tpu.memory_space<vmem>>, vector<64x1xf32>
    %4 = vector.broadcast %3 : vector<64x1xf32> to vector<64x128xf32>
    %5 = arith.addf %2, %4 : vector<64x128xf32>
    %cst_5 = arith.constant 0.000000e+00 : f32
    %6 = vector.broadcast %cst_5 : f32 to vector<64x128xf32>
    %7 = arith.maximumf %5, %6 : vector<64x128xf32>
    %c0_6 = arith.constant 0 : index
    %c0_7 = arith.constant 0 : index
    %8 = vector.load %arg4[%c0_6, %c0_7] : memref<32x64xf32, #tpu.memory_space<vmem>>, vector<32x64xf32>
    %cst_8 = arith.constant dense<0.000000e+00> : vector<32x128xf32>
    %9 = tpu.matmul %8, %7, %cst_8 {dimension_numbers = #tpu.dot_dimension_numbers<[1], [0], [0], [1], [0, 0, 1, 1], [], []>} : vector<32x64xf32>, vector<64x128xf32>, vector<32x128xf32> -> vector<32x128xf32>
    %c0_9 = arith.constant 0 : index
    %c0_10 = arith.constant 0 : index
    %10 = vector.load %arg5[%c0_9, %c0_10] : memref<32x1xf32, #tpu.memory_space<vmem>>, vector<32x1xf32>
    %11 = vector.broadcast %10 : vector<32x1xf32> to vector<32x128xf32>
    %12 = arith.addf %9, %11 : vector<32x128xf32>
    %cst_11 = arith.constant 0.000000e+00 : f32
    %13 = vector.broadcast %cst_11 : f32 to vector<32x128xf32>
    %14 = arith.maximumf %12, %13 : vector<32x128xf32>
    %c0_12 = arith.constant 0 : index
    %c0_13 = arith.constant 0 : index
    %15 = vector.load %arg6[%c0_12, %c0_13] : memref<32x32xf32, #tpu.memory_space<vmem>>, vector<32x32xf32>
    %cst_14 = arith.constant dense<0.000000e+00> : vector<32x128xf32>
    %16 = tpu.matmul %15, %14, %cst_14 {dimension_numbers = #tpu.dot_dimension_numbers<[1], [0], [0], [1], [0, 0, 1, 1], [], []>} : vector<32x32xf32>, vector<32x128xf32>, vector<32x128xf32> -> vector<32x128xf32>
    %c0_15 = arith.constant 0 : index
    %c0_16 = arith.constant 0 : index
    %17 = vector.load %arg7[%c0_15, %c0_16] : memref<32x1xf32, #tpu.memory_space<vmem>>, vector<32x1xf32>
    %18 = vector.broadcast %17 : vector<32x1xf32> to vector<32x128xf32>
    %19 = arith.addf %16, %18 : vector<32x128xf32>
    %cst_17 = arith.constant dense<0xFF800000> : vector<128xf32>
    %20 = vector.multi_reduction <maximumf>, %19, %cst_17 [0] : vector<32x128xf32> to vector<128xf32>
    %21 = vector.shape_cast %20 : vector<128xf32> to vector<1x128xf32>
    %22 = vector.broadcast %21 : vector<1x128xf32> to vector<32x128xf32>
    %23 = arith.subf %19, %22 : vector<32x128xf32>
    %24 = math.exp %23 : vector<32x128xf32>
    %c0_18 = arith.constant 0 : index
    %c0_19 = arith.constant 0 : index
    %25 = vector.load %arg8[%c0_18, %c0_19] : memref<32x32xf32, #tpu.memory_space<vmem>>, vector<32x32xf32>
    %cst_20 = arith.constant dense<0.000000e+00> : vector<32x128xf32>
    %26 = tpu.matmul %25, %24, %cst_20 {dimension_numbers = #tpu.dot_dimension_numbers<[1], [0], [0], [1], [0, 0, 1, 1], [], []>} : vector<32x32xf32>, vector<32x128xf32>, vector<32x128xf32> -> vector<32x128xf32>
    %cst_21 = arith.constant 1.000000e-30 : f32
    %27 = vector.broadcast %cst_21 : f32 to vector<32x128xf32>
    %28 = arith.maximumf %26, %27 : vector<32x128xf32>
    %29 = tpu.reciprocal %28 {approx = true} : vector<32x128xf32> -> vector<32x128xf32>
    %30 = arith.mulf %28, %29 : vector<32x128xf32>
    %cst_22 = arith.constant 2.000000e+00 : f32
    %31 = vector.broadcast %cst_22 : f32 to vector<32x128xf32>
    %32 = arith.subf %31, %30 : vector<32x128xf32>
    %33 = arith.mulf %29, %32 : vector<32x128xf32>
    %34 = arith.mulf %24, %33 : vector<32x128xf32>
    %cst_23 = arith.constant 1.000000e-03 : f32
    %35 = vector.broadcast %cst_23 : f32 to vector<32x128xf32>
    %36 = arith.maximumf %34, %35 : vector<32x128xf32>
    %c0_24 = arith.constant 0 : index
    %c0_25 = arith.constant 0 : index
    %37 = vector.load %arg9[%c0_24, %c0_25] : memref<4x32xf32, #tpu.memory_space<vmem>>, vector<4x32xf32>
    %cst_26 = arith.constant dense<0.000000e+00> : vector<4x128xf32>
    %38 = tpu.matmul %37, %36, %cst_26 {dimension_numbers = #tpu.dot_dimension_numbers<[1], [0], [0], [1], [0, 0, 1, 1], [], []>} : vector<4x32xf32>, vector<32x128xf32>, vector<4x128xf32> -> vector<4x128xf32>
    %c0_27 = arith.constant 0 : index
    %c0_28 = arith.constant 0 : index
    %39 = vector.load %arg10[%c0_27, %c0_28] : memref<4x128xf32, #tpu.memory_space<vmem>>, vector<4x128xf32>
    tpu.vector_store %arg10[%c0_27, %c0_28], %38 {strides = array<i32>} : memref<4x128xf32, #tpu.memory_space<vmem>>, vector<4x128xf32>,
    return
  }
  func.func @transform_0(%arg0: i32) -> (i32, i32) {
    %c0_i32 = arith.constant 0 : i32
    %c0_i32_0 = arith.constant 0 : i32
    return %c0_i32, %arg0 : i32, i32
  }
  func.func @transform_1(%arg0: i32) -> (i32, i32) {
    %c0_i32 = arith.constant 0 : i32
    %c0_i32_0 = arith.constant 0 : i32
    %c0_i32_1 = arith.constant 0 : i32
    return %c0_i32, %c0_i32_0 : i32, i32
  }
  func.func @transform_2(%arg0: i32) -> (i32, i32) {
    %c0_i32 = arith.constant 0 : i32
    %c0_i32_0 = arith.constant 0 : i32
    %c0_i32_1 = arith.constant 0 : i32
    return %c0_i32, %c0_i32_0 : i32, i32
  }
  func.func @transform_3(%arg0: i32) -> (i32, i32) {
    %c0_i32 = arith.constant 0 : i32
    %c0_i32_0 = arith.constant 0 : i32
    %c0_i32_1 = arith.constant 0 : i32
    return %c0_i32, %c0_i32_0 : i32, i32
  }
  func.func @transform_4(%arg0: i32) -> (i32, i32) {
    %c0_i32 = arith.constant 0 : i32
    %c0_i32_0 = arith.constant 0 : i32
    %c0_i32_1 = arith.constant 0 : i32
    return %c0_i32, %c0_i32_0 : i32, i32
  }
  func.func @transform_5(%arg0: i32) -> (i32, i32) {
    %c0_i32 = arith.constant 0 : i32
    %c0_i32_0 = arith.constant 0 : i32
    %c0_i32_1 = arith.constant 0 : i32
    return %c0_i32, %c0_i32_0 : i32, i32
  }
  func.func @transform_6(%arg0: i32) -> (i32, i32) {
    %c0_i32 = arith.constant 0 : i32
    %c0_i32_0 = arith.constant 0 : i32
    %c0_i32_1 = arith.constant 0 : i32
    return %c0_i32, %c0_i32_0 : i32, i32
  }
  func.func @transform_7(%arg0: i32) -> (i32, i32) {
    %c0_i32 = arith.constant 0 : i32
    %c0_i32_0 = arith.constant 0 : i32
    %c0_i32_1 = arith.constant 0 : i32
    return %c0_i32, %c0_i32_0 : i32, i32
  }
  func.func @transform_8(%arg0: i32) -> (i32, i32) {
    %c0_i32 = arith.constant 0 : i32
    %c0_i32_0 = arith.constant 0 : i32
    %c0_i32_1 = arith.constant 0 : i32
    return %c0_i32, %c0_i32_0 : i32, i32
  }
  func.func @transform_9(%arg0: i32) -> (i32, i32) {
    %c0_i32 = arith.constant 0 : i32
    %c0_i32_0 = arith.constant 0 : i32
    return %c0_i32, %arg0 : i32, i32
  }
}

</mosaic_0001>

<bundles_post_ra>
// kernel: tpu_custom_call.1
= control target key start
LH: loop header
LB: loop body
LE: loop exit
PB: predicated region body
PF: predicated region fallthrough
CT: control target
= control target key end

     0   :  { %vm91_vm0 = vcmask 130048   ;;  %v909_v4 = vmov 0   ;;  %s1104_s0 = inlined_call_operand.vmem [shape: f32[16,128], index: 0, kind: input, shape index: {}]   ;;  %s1105_s1 = inlined_call_operand.vmem [shape: f32[64,16], index: 1, kind: input, shape index: {}]   ;;  %s1106_s2 = inlined_call_operand.vmem [shape: f32[64,1], index: 2, kind: input, shape index: {}]   ;;  %s1107_s3 = inlined_call_operand.vmem [shape: f32[32,64], index: 3, kind: input, shape index: {}]   ;;  %s1108_s4 = inlined_call_operand.vmem [shape: f32[32,1], index: 4, kind: input, shape index: {}]   ;;  %s1109_s5 = inlined_call_operand.vmem [shape: f32[32,32], index: 5, kind: input, shape index: {}]   ;;  %s1110_s6 = inlined_call_operand.vmem [shape: f32[32,1], index: 6, kind: input, shape index: {}]   ;;  %s1111_s7 = inlined_call_operand.vmem [shape: f32[32,32], index: 7, kind: input, shape index: {}]   ;;  %s1112_s8 = inlined_call_operand.vmem [shape: f32[4,32], index: 8, kind: input, shape index: {}]   ;;  %s1113_s9 = inlined_call_operand.hbm [shape: f32[4,128], index: 9, kind: output, shape index: {}]  }
   0x1   :  { %v34_v0 = vld [vmem:[%s1104_s0 + $0x8] sm:$0xff]  ;;  %v33_v1 = vld [vmem:[%s1104_s0] sm:$0xff]  ;;  %869 = vset.pattern.permute.xlu0 %v909_v4  ;;  %v37_v5 = vld [vmem:[%s1105_s1 + $0x10] sm:$0xff]  ;;  %870 = vset.pattern.permute.xlu1 %v909_v4 }
   0x2   :  { %v35_v2 = vld [vmem:[%s1105_s1] sm:$0xff]  ;;  %788 = vmatprep.subr.mxu0 %v34_v0  ;;  %v36_v3 = vld [vmem:[%s1105_s1 + $0x8] sm:$0xff]  ;;  %v50_v6 = vld [vmem:[%s1106_s2 + $0x38] sm:$0xff] }
   0x3   :  { %792 = vmatprep.mubr.msk.f32.mxu0 %vm91_vm0, %v35_v2  ;;  %789 = vmatpush3.msra.mxu0 %v34_v0  ;;  %v48_v7 = vld [vmem:[%s1106_s2 + $0x28] sm:$0xff]  ;;  %v49_v8 = vld [vmem:[%s1106_s2 + $0x30] sm:$0xff]  ;;  %v38_v9 = vld [vmem:[%s1105_s1 + $0x18] sm:$0xff] }
   0x4   :  { %790 = vmatprep.subr.mxu0 %v33_v1  ;;  %88 = vperm.xlu0 %869, %v50_v6   ;;  %v47_v10 = vld [vmem:[%s1106_s2 + $0x20] sm:$0xff] }
   0x5   :  { %791 = vmatpush3.msra.mxu0 %v33_v1  ;;  %78 = vperm.xlu1 %870, %v48_v7   ;;  %v39_v11 = vld [vmem:[%s1105_s1 + $0x20] sm:$0xff] }
   0x6   :  { %793 = vmatmul.mubr.msk.f32.vlgmr.msra.gmra.mxu0 %vm91_vm0, %v36_v3 }
   0x7   :  { %795 = vmatprep.mubr.msk.f32.mxu0 %vm91_vm0, %v37_v5 }
   0x8   :  { %83 = vperm.xlu0 %869, %v49_v8  }
   0x9   :  { %14 = vsyncpa [#allocation3], 0  ;;  %73 = vperm.xlu1 %870, %v47_v10   ;;  %v46_v12 = vld [vmem:[%s1106_s2 + $0x18] sm:$0xff]  ;;  %v40_v13 = vld [vmem:[%s1105_s1 + $0x28] sm:$0xff]  ;;  %vm257_vm1 = vcmask 523264   ;;  %vm387_vm2 = vcmask 261120  }
   0xa   :  { %796 = vmatmul.mubr.msk.f32.gmra.mxu0 %vm91_vm0, %v38_v9  ;;  %v45_v14 = vld [vmem:[%s1106_s2 + $0x10] sm:$0xff]  ;;  %v44_v16 = vld [vmem:[%s1106_s2 + $0x8] sm:$0xff]  ;;  %v42_v17 = vld [vmem:[%s1105_s1 + $0x38] sm:$0xff]  ;;  %vm911_vm3 = vmmov 0   ;;  %s912_s12 = smov [#allocation2]  }
   0xb   :  { %798 = vmatprep.mubr.msk.f32.mxu0 %vm91_vm0, %v39_v11  ;;  %v41_v15 = vld [vmem:[%s1105_s1 + $0x30] sm:$0xff]  ;;  %v43_v18 = vld [vmem:[%s1106_s2] sm:$0xff]  ;;  %v236_v19 = vld [vmem:[%s1108_s4 + $0x18] sm:$0xff]  ;;  %s716_s13 = sshll.u32 %s912_s12, 4  ;;  %s717_s13 = int_to_ptr.vmem [resolvable:$true] %s716_s13 }
   0xc   :  { %68 = vperm.xlu0 %869, %v46_v12   ;;  %v235_v20 = vld [vmem:[%s1108_s4 + $0x10] sm:$0xff]  ;;  %v234_v21 = vld [vmem:[%s1108_s4 + $0x8] sm:$0xff]  ;;  %v233_v22 = vld [vmem:[%s1108_s4] sm:$0xff]  ;;  %s887_s14 = scalar_lea.vmem %s717_s13, 64  ;;  %p892_p1 = scmp.lt.s32.totalorder %s717_s13, %s717_s13 }
   0xd   :  { %63 = vperm.xlu1 %870, %v45_v14   ;;  %v363_v23 = vld [vmem:[%s1110_s6] sm:$0xff]  ;;  %v364_v24 = vld [vmem:[%s1110_s6 + $0x8] sm:$0xff]  ;;  %v365_v25 = vld [vmem:[%s1110_s6 + $0x10] sm:$0xff]  ;;  %p888_p0 = scmp.ne.s32.totalorder %s717_s13, %s887_s14  ;;  %p893_p2 = scmp.lt.s32.totalorder %s887_s14, %s887_s14 }
   0xe   :  { %799 = vmatmul.mubr.msk.f32.gmra.mxu0 %vm91_vm0, %v40_v13  ;;  %v366_v26 = vld [vmem:[%s1110_s6 + $0x18] sm:$0xff]  ;;  %v229_v27 = vld [vmem:[%s1107_s3] sm:$0xff]  ;;  %v230_v60 = vld [vmem:[%s1107_s3 + $0x8] sm:$0xff] }
   0xf   :  { %801 = vmatprep.mubr.msk.f32.mxu0 %vm91_vm0, %v41_v15  ;;  %820 = vmatprep.mubr.msk.f32.mxu1 %vm257_vm1, %v229_v27  ;;  %v231_v61 = vld [vmem:[%s1107_s3 + $0x10] sm:$0xff]  ;;  %v232_v62 = vld [vmem:[%s1107_s3 + $0x18] sm:$0xff]  ;;  %v359_v63 = vld [vmem:[%s1109_s5] sm:$0xff]  ;;  %p894_p3 = por %p893_p2, %p892_p1 }
  0x10   :  { %58 = vperm.xlu0 %869, %v44_v16   ;;  %v360_v16 = vld [vmem:[%s1109_s5 + $0x8] sm:$0xff] }
  0x11   :  { %53 = vperm.xlu1 %870, %v43_v18   ;;  %v362_v18 = vld [vmem:[%s1109_s5 + $0x18] sm:$0xff]  ;;  %p895_p4 = pnand %p894_p3, %p888_p0 }
  0x12   :  { %802 = vmatmul.mubr.msk.f32.gmra.mxu0 %vm91_vm0, %v42_v17  ;;  %v361_v17 = vld [vmem:[%s1109_s5 + $0x10] sm:$0xff] }
  0x13   :  { %834 = vmatprep.mubr.msk.f32.mxu0 %vm387_vm2, %v359_v63 }
  0x14   :  { %254 = vperm.xlu0 %869, %v236_v19   ;;  %v506_v19 = vld [vmem:[%s1111_s7] sm:$0xff] }
  0x15   :  { %249 = vperm.xlu1 %870, %v235_v20  }
  0x18   :  { %244 = vperm.xlu0 %869, %v234_v21  }
  0x19   :  { %239 = vperm.xlu1 %870, %v233_v22  }
  0x1c   :  { %369 = vperm.xlu0 %869, %v363_v23  }
  0x1d   :  { %374 = vperm.xlu1 %870, %v364_v24  }
  0x20   :  { %379 = vperm.xlu0 %869, %v365_v25  }
  0x21   :  { %384 = vperm.xlu1 %870, %v366_v26  }
  0x7f   :  { %v89_v30 = vpop.permute.xlu0 %88 }
  0x80   :  { %v79_v32 = vpop.permute.xlu1 %78 }
  0x83   :  { %v84_v35 = vpop.permute.xlu0 %83 }
  0x84   :  { %v74_v37 = vpop.permute.xlu1 %73 }
  0x87   :  { %v69_v44 = vpop.permute.xlu0 %68 }
  0x88   :  { %v64_v47 = vpop.permute.xlu1 %63 }
  0x8b   :  { %v59_v52 = vpop.permute.xlu0 %58 }
  0x8c   :  { %v54_v55 = vpop.permute.xlu1 %53 }
  0x8f   :  { %v255_v0 = vpop.permute.xlu0 %254 }
  0x90   :  { %v250_v2 = vpop.permute.xlu1 %249 }
  0x93   :  { %v245_v6 = vpop.permute.xlu0 %244 }
  0x94   :  { %v240_v11 = vpop.permute.xlu1 %239 }
  0x97   :  { %v370_v20 = vpop.permute.xlu0 %369 }
  0x98   :  { %v375_v21 = vpop.permute.xlu1 %374 }
  0x9b   :  { %v380_v25 = vpop.permute.xlu0 %379 }
  0x9c   :  { %v385_v27 = vpop.permute.xlu1 %384 }
  0xc6   :  { %v794_v28 = vpop.f32.mrf.mxu0 }
  0xc7   :  { %v188_v53 = vadd.f32 %v794_v28, %v59_v52 }
  0xc8   :  { %v182_v29 = vpop.f32.mrf.mxu0 }
  0xc9   :  { %v183_v56 = vadd.f32 %v182_v29, %v54_v55  ;;  %v222_v58 = vmax.f32 %v188_v53, 0.0  ;;  %v507_v53 = vld [vmem:[%s1111_s7 + $0x8] sm:$0xff]  ;;  %v509_v55 = vld [vmem:[%s1111_s7 + $0x18] sm:$0xff] }
  0xca   :  { %v797_v31 = vpop.f32.mrf.mxu0 }
  0xcb   :  { %v198_v48 = vadd.f32 %v797_v31, %v69_v44  ;;  %v221_v59 = vmax.f32 %v183_v56, 0.0  ;;  %v910_v56 = vmov 0.0  }
  0xcc   :  { %v192_v33 = vpop.f32.mrf.mxu0 }
  0xcd   :  { %v193_v50 = vadd.f32 %v192_v33, %v64_v47  ;;  %v224_v54 = vmax.f32 %v198_v48, 0.0 }
  0xce   :  { %v800_v34 = vpop.f32.mrf.mxu0 }
  0xcf   :  { %v208_v41 = vadd.f32 %v800_v34, %v79_v32  ;;  %v223_v57 = vmax.f32 %v193_v50, 0.0 }
  0xd0   :  { %v202_v36 = vpop.f32.mrf.mxu0 }
  0xd1   :  { %v203_v45 = vadd.f32 %v202_v36, %v74_v37  ;;  %v226_v49 = vmax.f32 %v208_v41, 0.0 }
  0xd2   :  { %v803_v38 = vpop.f32.mrf.mxu0 }
  0xd3   :  { %v218_v39 = vadd.f32 %v803_v38, %v89_v30  ;;  %v225_v51 = vmax.f32 %v203_v45, 0.0 }
  0xd4   :  { %v212_v40 = vpop.f32.mrf.mxu0 }
  0xd5   :  { %v228_v42 = vmax.f32 %v218_v39, 0.0  ;;  %v213_v43 = vadd.f32 %v212_v40, %v84_v35 }
  0xd7   :  { %v227_v46 = vmax.f32 %v213_v43, 0.0  ;;  %804 = vmatprep.subr.mxu1 %v228_v42 }
  0xd8   :  { %805 = vmatpush3.msra.mxu1 %v228_v42 }
  0xd9   :  { %806 = vmatprep.subr.mxu1 %v227_v46 }
  0xda   :  { %807 = vmatpush3.msra.mxu1 %v227_v46 }
  0xdb   :  { %808 = vmatprep.subr.mxu1 %v226_v49 }
  0xdc   :  { %809 = vmatpush3.msra.mxu1 %v226_v49 }
  0xdd   :  { %810 = vmatprep.subr.mxu1 %v225_v51 }
  0xde   :  { %811 = vmatpush3.msra.mxu1 %v225_v51 }
  0xdf   :  { %812 = vmatprep.subr.mxu1 %v224_v54 }
  0xe0   :  { %813 = vmatpush3.msra.mxu1 %v224_v54  ;;  %v508_v54 = vld [vmem:[%s1111_s7 + $0x10] sm:$0xff] }
  0xe1   :  { %814 = vmatprep.subr.mxu1 %v223_v57 }
  0xe2   :  { %815 = vmatpush3.msra.mxu1 %v223_v57 }
  0xe3   :  { %816 = vmatprep.subr.mxu1 %v222_v58 }
  0xe4   :  { %817 = vmatpush3.msra.mxu1 %v222_v58 }
  0xe5   :  { %818 = vmatprep.subr.mxu1 %v221_v59 }
  0xe6   :  { %819 = vmatpush3.msra.mxu1 %v221_v59 }
  0xe7   :  { %821 = vmatmul.mubr.msk.f32.vlgmr.msra.gmra.mxu1 %vm257_vm1, %v230_v60 }
  0xe8   :  { %823 = vmatprep.mubr.msk.f32.mxu1 %vm257_vm1, %v231_v61 }
  0xeb   :  { %824 = vmatmul.mubr.msk.f32.gmra.mxu1 %vm257_vm1, %v232_v62 }
  0xec   :  { %848 = vmatprep.mubr.msk.f32.mxu1 %vm387_vm2, %v506_v19 }
 0x1a7   :  { %v822_v1 = vpop.f32.mrf.mxu1 }
 0x1a8   :  { %v342_v8 = vadd.f32 %v822_v1, %v245_v6 }
 0x1a9   :  { %v336_v3 = vpop.f32.mrf.mxu1 }
 0x1aa   :  { %v337_v12 = vadd.f32 %v336_v3, %v240_v11  ;;  %v356_v14 = vmax.f32 %v342_v8, 0.0 }
 0x1ab   :  { %v825_v4 = vpop.f32.mrf.mxu1 }
 0x1ac   :  { %v352_v5 = vadd.f32 %v825_v4, %v255_v0  ;;  %v355_v15 = vmax.f32 %v337_v12, 0.0 }
 0x1ad   :  { %v346_v7 = vpop.f32.mrf.mxu1 }
 0x1ae   :  { %v358_v9 = vmax.f32 %v352_v5, 0.0  ;;  %v347_v10 = vadd.f32 %v346_v7, %v250_v2 }
 0x1b0   :  { %v357_v13 = vmax.f32 %v347_v10, 0.0  ;;  %826 = vmatprep.subr.mxu0 %v358_v9 }
 0x1b1   :  { %827 = vmatpush3.msra.mxu0 %v358_v9 }
 0x1b2   :  { %828 = vmatprep.subr.mxu0 %v357_v13 }
 0x1b3   :  { %829 = vmatpush3.msra.mxu0 %v357_v13 }
 0x1b4   :  { %830 = vmatprep.subr.mxu0 %v356_v14 }
 0x1b5   :  { %831 = vmatpush3.msra.mxu0 %v356_v14 }
 0x1b6   :  { %832 = vmatprep.subr.mxu0 %v355_v15 }
 0x1b7   :  { %833 = vmatpush3.msra.mxu0 %v355_v15 }
 0x1b8   :  { %835 = vmatmul.mubr.msk.f32.vlgmr.msra.gmra.mxu0 %vm387_vm2, %v360_v16  ;;  %854 = vmatprep.subr.mxu0 %v910_v56 }
 0x1b9   :  { %837 = vmatprep.mubr.msk.f32.mxu0 %vm387_vm2, %v361_v17 }
 0x1bc   :  { %838 = vmatmul.mubr.msk.f32.gmra.mxu0 %vm387_vm2, %v362_v18 }
 0x1bd   :  { %862 = vmatprep.mubr.msk.f32.mxu0 %vm911_vm3, %v910_v56 }
 0x278   :  { %v836_v22 = vpop.f32.mrf.mxu0 }
 0x279   :  { %v472_v29 = vadd.f32 %v836_v22, %v375_v21 }
 0x27a   :  { %v466_v23 = vpop.f32.mrf.mxu0 }
 0x27b   :  { %v467_v26 = vadd.f32 %v466_v23, %v370_v20 }
 0x27c   :  { %v839_v24 = vpop.f32.mrf.mxu0 }
 0x27d   :  { %v482_v30 = vadd.f32 %v839_v24, %v385_v27  ;;  %v485_v32 = vmax.f32 %v467_v26, %v472_v29 }
 0x27e   :  { %v476_v28 = vpop.f32.mrf.mxu0 }
 0x27f   :  { %v477_v31 = vadd.f32 %v476_v28, %v380_v25  ;;  %v635_v25 = vld [vmem:[%s1112_s8] sm:$0xf] }
 0x281   :  { %v486_v33 = vmax.f32 %v477_v31, %v482_v30 }
 0x283   :  { %v487_v34 = vmax.f32 %v485_v32, %v486_v33 }
 0x285   :  { %v488_v35 = vrot.slane %v487_v34, 4 }
 0x287   :  { %v489_v36 = vmax.f32 %v487_v34, %v488_v35 }
 0x289   :  { %v490_v37 = vrot.slane %v489_v36, 2 }
 0x28b   :  { %v491_v38 = vmax.f32 %v489_v36, %v490_v37 }
 0x28d   :  { %v492_v39 = vrot.slane %v491_v38, 1 }
 0x28f   :  { %v493_v40 = vmax.f32 %v491_v38, %v492_v39 }
 0x291   :  { %v497_v41 = vsub.f32 %v482_v30, %v493_v40  ;;  %v496_v42 = vsub.f32 %v477_v31, %v493_v40  ;;  %v495_v43 = vsub.f32 %v472_v29, %v493_v40  ;;  %v494_v45 = vsub.f32 %v467_v26, %v493_v40 }
 0x293   :  { %v504_v44 = vmul.f32 1.442695, %v497_v41  ;;  %v502_v46 = vmul.f32 1.442695, %v496_v42  ;;  %v500_v47 = vmul.f32 1.442695, %v495_v43 }
 0x294   :  { %v498_v48 = vmul.f32 1.442695, %v494_v45 }
 0x295   :  { %871 = vpow2.f32 %v504_v44 }
 0x296   :  { %873 = vpow2.f32 %v502_v46 }
 0x297   :  { %875 = vpow2.f32 %v500_v47 }
 0x298   :  { %877 = vpow2.f32 %v498_v48 }
 0x2a2   :  { %v872_v49 = vpop.eup %871 }
 0x2a3   :  { %840 = vmatprep.subr.mxu1 %v872_v49  ;;  %v874_v50 = vpop.eup %873 }
 0x2a4   :  { %841 = vmatpush3.msra.mxu1 %v872_v49  ;;  %v876_v51 = vpop.eup %875 }
 0x2a5   :  { %842 = vmatprep.subr.mxu1 %v874_v50  ;;  %v878_v52 = vpop.eup %877 }
 0x2a6   :  { %843 = vmatpush3.msra.mxu1 %v874_v50 }
 0x2a7   :  { %844 = vmatprep.subr.mxu1 %v876_v51 }
 0x2a8   :  { %845 = vmatpush3.msra.mxu1 %v876_v51 }
 0x2a9   :  { %846 = vmatprep.subr.mxu1 %v878_v52 }
 0x2aa   :  { %847 = vmatpush3.msra.mxu1 %v878_v52 }
 0x2ab   :  { %849 = vmatmul.mubr.msk.f32.vlgmr.msra.gmra.mxu1 %vm387_vm2, %v507_v53 }
 0x2ac   :  { %851 = vmatprep.mubr.msk.f32.mxu1 %vm387_vm2, %v508_v54 }
 0x2af   :  { %852 = vmatmul.mubr.msk.f32.gmra.mxu1 %vm387_vm2, %v509_v55 }
 0x36b   :  { %v850_v57 = vpop.f32.mrf.mxu1 }
 0x36c   :  { %v608_v58 = vmax.f32 %v850_v57, 1e-30 }
 0x36d   :  { %v588_v59 = vpop.f32.mrf.mxu1 }
 0x36e   :  { %879 = vrcp.f32 %v608_v58  ;;  %v607_v60 = vmax.f32 %v588_v59, 1e-30 }
 0x36f   :  { %v853_v61 = vpop.f32.mrf.mxu1 }
 0x370   :  { %881 = vrcp.f32 %v607_v60  ;;  %v610_v62 = vmax.f32 %v853_v61, 1e-30 }
 0x371   :  { %v598_v63 = vpop.f32.mrf.mxu1 }
 0x372   :  { %883 = vrcp.f32 %v610_v62  ;;  %v609_v0 = vmax.f32 %v598_v63, 1e-30 }
 0x374   :  { %885 = vrcp.f32 %v609_v0 }
 0x37b   :  { %v880_v1 = vpop.eup %879 }
 0x37c   :  { %v616_v2 = vmul.f32 %v880_v1, %v608_v58 }
 0x37d   :  { %v882_v3 = vpop.eup %881 }
 0x37e   :  { %v615_v4 = vmul.f32 %v882_v3, %v607_v60  ;;  %v620_v6 = vsub.f32 2.0, %v616_v2 }
 0x37f   :  { %v884_v5 = vpop.eup %883 }
 0x380   :  { %v618_v7 = vmul.f32 %v884_v5, %v610_v62  ;;  %v619_v9 = vsub.f32 2.0, %v615_v4  ;;  %v624_v12 = vmul.f32 %v880_v1, %v620_v6 }
 0x381   :  { %v886_v8 = vpop.eup %885 }
 0x382   :  { %v622_v10 = vsub.f32 2.0, %v618_v7  ;;  %v617_v11 = vmul.f32 %v886_v8, %v609_v0  ;;  %v623_v15 = vmul.f32 %v882_v3, %v619_v9  ;;  %v628_v18 = vmul.f32 %v876_v51, %v624_v12 }
 0x384   :  { %v626_v13 = vmul.f32 %v884_v5, %v622_v10  ;;  %v621_v14 = vsub.f32 2.0, %v617_v11  ;;  %v627_v21 = vmul.f32 %v878_v52, %v623_v15  ;;  %v632_v23 = vmax.f32 %v628_v18, 0.001 }
 0x386   :  { %v630_v16 = vmul.f32 %v872_v49, %v626_v13  ;;  %v625_v17 = vmul.f32 %v886_v8, %v621_v14  ;;  %v631_v24 = vmax.f32 %v627_v21, 0.001 }
 0x388   :  { %v629_v19 = vmul.f32 %v874_v50, %v625_v17  ;;  %v634_v20 = vmax.f32 %v630_v16, 0.001 }
 0x38a   :  { %v633_v22 = vmax.f32 %v629_v19, 0.001  ;;  %855 = vmatpush3.msra.mxu0 %v634_v20 }
 0x38b   :  { %856 = vmatprep.subr.mxu0 %v910_v56 }
 0x38c   :  { %857 = vmatpush3.msra.mxu0 %v633_v22 }
 0x38d   :  { %858 = vmatprep.subr.mxu0 %v910_v56 }
 0x38e   :  { %859 = vmatpush3.msra.mxu0 %v632_v23 }
 0x38f   :  { %860 = vmatprep.subr.mxu0 %v910_v56 }
 0x390   :  { %861 = vmatpush3.msra.mxu0 %v631_v24 }
 0x391   :  { %863 = vmatmul.mubr.msk.f32.vlgmr.msra.gmra.mxu0 %vm387_vm2, %v635_v25 }
 0x451   :  { %v705_v26 = vpop.f32.mrf.mxu0 }
 0x452   :  { %709 = vst [vmem:[#allocation2] sm:$0xf] %v705_v26 }
 0x453   :  { %v864_v27 = vpop.f32.mrf.mxu0 }
 0x454   :  { %898 = shalt.err (!%p895_p4)
}
 0x455   :  { %719 = dma.vmem_to_hbm [thread:$0]  %s717_s13, 64, %s1113_s9, [#allocation3]  }
 0x456   :  { %907 = dma.done.wait [#allocation3], 64  }
 0x457   :  { %908 = vsyncadd [#allocation3], 4294967232 }
 0x458   :  { %723 = vsyncpa [#allocation3], 1 }

</bundles_post_ra>
